<compile_context>
chip_gen: v5e
topology: v5e:2x2
jax: 0.10.0
libtpu: 0.0.40
codegen_flags: <defaults>
</compile_context>

<pallas_src>
import math

import jax
import jax.numpy as jnp
from jax import lax
from jax.experimental import pallas as pl
from jax.experimental.pallas import tpu as pltpu


def _round_up(x, m):
    return ((x + m - 1) // m) * m


def _cdiv(a, b):
    return (a + b - 1) // b


def _tensorcores_per_chip():
    """Heuristic core count: 2 TCs/chip on v7x (and v3/v4-class parts), else 1."""
    try:
        kind = jax.devices()[0].device_kind.lower()
    except Exception:
        return 1
    if "v7" in kind or "v4" in kind or "v3" in kind:
        return 2
    return 1


def critic_kernel(s_ref, a_ref, w1s_ref, w1a_ref, b1_ref, w2_ref, b2_ref,
                  w3r_ref, b3_ref, o_ref):
    # Layer 1: dot(state, W1_s) + dot(action, W1_a) == dot(cat(s, a), W1);
    # the split avoids materializing the concatenated activation anywhere.
    h1 = jnp.dot(s_ref[...], w1s_ref[...], preferred_element_type=jnp.float32)
    h1 = h1 + jnp.dot(a_ref[...], w1a_ref[...],
                      preferred_element_type=jnp.float32)
    h1 = jnp.maximum(h1 + b1_ref[...], 0.0)

    # Layer 2.
    h2 = jnp.dot(h1, w2_ref[...], preferred_element_type=jnp.float32) + b2_ref[...]
    h2 = jnp.maximum(h2, 0.0)

    # Layer 3 (H -> 1): contract H of (1, H) x (TB, H) on the MXU; the result
    # is a lane-dense (1, TB) row, so the store is full-vreg, not masked.
    q = lax.dot_general(w3r_ref[...], h2,
                        dimension_numbers=(((1,), (1,)), ((), ())),
                        preferred_element_type=jnp.float32)
    o_ref[...] = q + b3_ref[0, 0]


_MAX_BLOCK_B = 8192  # rows per grid step; keeps per-step activations ~1 MiB


def critic_forward(state, action, prepared_params, *, block_b=None):
    """state: (B, n_states), action: (B, n_actions) -> (B, 1).

    `prepared_params` must come from `prepare_critic_params` (all weight
    splitting/transposition is done once, outside the per-call path).
    """
    w1_s, w1_a, b1, w2, b2, w3_row, b3 = prepared_params
    state = state.astype(jnp.float32)
    action = action.astype(jnp.float32)

    B, n_states = state.shape
    n_actions = action.shape[1]

    # ---- Batch tile selection -------------------------------------------
    if block_b is None:
        cores = _tensorcores_per_chip()
        if cores > 1 and B >= 2 * 128:
            # v7x: split into >= 2 lane-aligned parallel steps so both
            # TensorCores get a share of the batch.
            block_b = _round_up(_cdiv(B, cores), 128)
        else:
            # v5e/v6e (single TC): one grid step -> no per-step overhead and
            # no padding (every block equals the full array dims).
            block_b = B
        block_b = min(block_b, _MAX_BLOCK_B)
    else:
        # Explicit override (e.g. tests): multi-step blocks must be
        # lane-aligned for the (1, block_b) output tile.
        block_b = B if block_b >= B else _round_up(block_b, 128)

    num_steps = _cdiv(B, block_b)
    Bp = num_steps * block_b
    if Bp != B:
        pad = Bp - B
        state = jnp.pad(state, ((0, pad), (0, 0)))
        action = jnp.pad(action, ((0, pad), (0, 0)))

    def resident(arr):
        # Same block every grid step -> stays VMEM-resident, no re-DMA.
        return pl.BlockSpec(arr.shape, lambda i: (0, 0))

    out = pl.pallas_call(
        critic_kernel,
        out_shape=jax.ShapeDtypeStruct((1, Bp), jnp.float32),
        grid=(num_steps,),
        in_specs=[
            pl.BlockSpec((block_b, n_states), lambda i: (i, 0)),
            pl.BlockSpec((block_b, n_actions), lambda i: (i, 0)),
            resident(w1_s),
            resident(w1_a),
            resident(b1),
            resident(w2),
            resident(b2),
            resident(w3_row),
            pl.BlockSpec(memory_space=pltpu.MemorySpace.SMEM),  # b3 scalar
        ],
        out_specs=pl.BlockSpec((1, block_b), lambda i: (0, i)),
        compiler_params=pltpu.CompilerParams(
            dimension_semantics=("parallel",)),
    )(state, action, w1_s, w1_a, b1, w2, b2, w3_row, b3)

    # Lane-dense kernel output (1, Bp) -> module's (B, 1).
    return jnp.reshape(out[0, :B], (B, 1))


def init_critic_params(key, n_states, n_actions, hidden_dim, init_w=0.003):
    """Deterministic init mirroring nn.Linear defaults + the linear3 override.

    Weights are returned as (in, out); biases as (1, out).
    """
    k1w, k1b, k2w, k2b, k3w, k3b = jax.random.split(key, 6)
    in1 = n_states + n_actions

    def uniform(k, shape, bound):
        return jax.random.uniform(
            k, shape, dtype=jnp.float32, minval=-bound, maxval=bound)

    bound1 = 1.0 / math.sqrt(in1)
    bound2 = 1.0 / math.sqrt(hidden_dim)
    w1 = uniform(k1w, (in1, hidden_dim), bound1)
    b1 = uniform(k1b, (1, hidden_dim), bound1)
    w2 = uniform(k2w, (hidden_dim, hidden_dim), bound2)
    b2 = uniform(k2b, (1, hidden_dim), bound2)
    # linear3 uses uniform_(-init_w, init_w) for both weight and bias.
    w3 = uniform(k3w, (hidden_dim, 1), init_w)
    b3 = uniform(k3b, (1, 1), init_w)
    return (w1, b1, w2, b2, w3, b3)


def prepare_critic_params(params, n_states):
    """One-time weight plumbing hoisted out of the per-call forward:
    split W1 into state/action halves, lay W3 out as a (1, H) row, b3 (1,1)."""
    w1, b1, w2, b2, w3, b3 = (jnp.asarray(p, jnp.float32) for p in params)
    hidden = w1.shape[1]
    w1_s = w1[:n_states]
    w1_a = w1[n_states:]
    w3_row = jnp.reshape(jnp.transpose(w3), (1, hidden))
    b3 = jnp.reshape(b3, (1, 1))
    return (w1_s, w1_a, b1, w2, b2, w3_row, b3)


def critic_reference(state, action, params):
    w1, b1, w2, b2, w3, b3 = params
    x = jnp.concatenate([state, action], axis=1)
    h1 = jax.nn.relu(x @ w1 + b1)
    h2 = jax.nn.relu(h1 @ w2 + b2)
    return h2 @ w3 + b3


if __name__ == "__main__":
    key = jax.random.PRNGKey(0)
    kp, ks, ka, ks2, ka2 = jax.random.split(key, 5)

    batch = 8
    n_states = 12
    n_actions = 4
    hidden_dim = 32

    raw_params = init_critic_params(kp, n_states, n_actions, hidden_dim)
    params = prepare_critic_params(raw_params, n_states)

    # Small case: single grid step, no padding, lane-dense (1, B) output.
    state = jax.random.normal(ks, (batch, n_states), dtype=jnp.float32)
    action = jax.random.normal(ka, (batch, n_actions), dtype=jnp.float32)
    out = jax.block_until_ready(critic_forward(state, action, params))
    ref = critic_reference(state, action, raw_params)
    assert out.shape == (batch, 1)
    assert jnp.allclose(out, ref, atol=1e-5, rtol=1e-5)

    # Larger ragged case: exercises the multi-step batch grid, resident
    # weights, and pad-and-slice tails (B=300, TB=128 -> grid of 3).
    big_b = 300
    state2 = jax.random.normal(ks2, (big_b, n_states), dtype=jnp.float32)
    action2 = jax.random.normal(ka2, (big_b, n_actions), dtype=jnp.float32)
    out2 = jax.block_until_ready(
        critic_forward(state2, action2, params, block_b=128))
    ref2 = critic_reference(state2, action2, raw_params)
    assert out2.shape == (big_b, 1)
    assert jnp.allclose(out2, ref2, atol=1e-5, rtol=1e-5)

    print("KERNEL_OK")
</pallas_src>

<mosaic_0001>
module attributes {stable_mosaic.version = 11 : i64} {
  func.func @critic_kernel(%arg0: i32, %arg1: memref<8x12xf32, #tpu.memory_space<vmem>>, %arg2: memref<8x4xf32, #tpu.memory_space<vmem>>, %arg3: memref<12x32xf32, #tpu.memory_space<vmem>>, %arg4: memref<4x32xf32, #tpu.memory_space<vmem>>, %arg5: memref<1x32xf32, #tpu.memory_space<vmem>>, %arg6: memref<32x32xf32, #tpu.memory_space<vmem>>, %arg7: memref<1x32xf32, #tpu.memory_space<vmem>>, %arg8: memref<1x32xf32, #tpu.memory_space<vmem>>, %arg9: memref<1x1xf32, #tpu.memory_space<smem>>, %arg10: memref<1x8xf32, #tpu.memory_space<vmem>>) attributes {dimension_semantics = [#tpu.dimension_semantics<parallel>], iteration_bounds = array<i64: 1>, scalar_prefetch = 0 : i64, scratch_operands = 0 : i64, tpu.core_type = #tpu.core_type<tc>, window_params = [{transform_indices = @transform_0, window_bounds = array<i64: 8, 12>}, {transform_indices = @transform_1, window_bounds = array<i64: 8, 4>}, {pipeline_mode = #tpu.pipeline_mode<synchronous>, transform_indices = @transform_2, window_bounds = array<i64: 12, 32>}, {pipeline_mode = #tpu.pipeline_mode<synchronous>, transform_indices = @transform_3, window_bounds = array<i64: 4, 32>}, {pipeline_mode = #tpu.pipeline_mode<synchronous>, transform_indices = @transform_4, window_bounds = array<i64: 1, 32>}, {pipeline_mode = #tpu.pipeline_mode<synchronous>, transform_indices = @transform_5, window_bounds = array<i64: 32, 32>}, {pipeline_mode = #tpu.pipeline_mode<synchronous>, transform_indices = @transform_6, window_bounds = array<i64: 1, 32>}, {pipeline_mode = #tpu.pipeline_mode<synchronous>, transform_indices = @transform_7, window_bounds = array<i64: 1, 32>}, {transform_indices = @transform_8, window_bounds = array<i64: 1, 1>}, {transform_indices = @transform_9, window_bounds = array<i64: 1, 8>}]} {
    %c0 = arith.constant 0 : index
    %c0_0 = arith.constant 0 : index
    %0 = vector.load %arg1[%c0, %c0_0] : memref<8x12xf32, #tpu.memory_space<vmem>>, vector<8x12xf32>
    %c0_1 = arith.constant 0 : index
    %c0_2 = arith.constant 0 : index
    %1 = vector.load %arg3[%c0_1, %c0_2] : memref<12x32xf32, #tpu.memory_space<vmem>>, vector<12x32xf32>
    %cst = arith.constant dense<0.000000e+00> : vector<8x32xf32>
    %2 = tpu.matmul %0, %1, %cst {dimension_numbers = #tpu.dot_dimension_numbers<[1], [0], [0], [1], [0, 0, 1, 1], [], []>} : vector<8x12xf32>, vector<12x32xf32>, vector<8x32xf32> -> vector<8x32xf32>
    %c0_3 = arith.constant 0 : index
    %c0_4 = arith.constant 0 : index
    %3 = vector.load %arg2[%c0_3, %c0_4] : memref<8x4xf32, #tpu.memory_space<vmem>>, vector<8x4xf32>
    %c0_5 = arith.constant 0 : index
    %c0_6 = arith.constant 0 : index
    %4 = vector.load %arg4[%c0_5, %c0_6] : memref<4x32xf32, #tpu.memory_space<vmem>>, vector<4x32xf32>
    %cst_7 = arith.constant dense<0.000000e+00> : vector<8x32xf32>
    %5 = tpu.matmul %3, %4, %cst_7 {dimension_numbers = #tpu.dot_dimension_numbers<[1], [0], [0], [1], [0, 0, 1, 1], [], []>} : vector<8x4xf32>, vector<4x32xf32>, vector<8x32xf32> -> vector<8x32xf32>
    %6 = arith.addf %2, %5 : vector<8x32xf32>
    %c0_8 = arith.constant 0 : index
    %c0_9 = arith.constant 0 : index
    %7 = vector.load %arg5[%c0_8, %c0_9] : memref<1x32xf32, #tpu.memory_space<vmem>>, vector<1x32xf32>
    %8 = vector.broadcast %7 : vector<1x32xf32> to vector<8x32xf32>
    %9 = arith.addf %6, %8 : vector<8x32xf32>
    %cst_10 = arith.constant 0.000000e+00 : f32
    %10 = vector.broadcast %cst_10 : f32 to vector<8x32xf32>
    %11 = arith.maximumf %9, %10 : vector<8x32xf32>
    %c0_11 = arith.constant 0 : index
    %c0_12 = arith.constant 0 : index
    %12 = vector.load %arg6[%c0_11, %c0_12] : memref<32x32xf32, #tpu.memory_space<vmem>>, vector<32x32xf32>
    %cst_13 = arith.constant dense<0.000000e+00> : vector<8x32xf32>
    %13 = tpu.matmul %11, %12, %cst_13 {dimension_numbers = #tpu.dot_dimension_numbers<[1], [0], [0], [1], [0, 0, 1, 1], [], []>} : vector<8x32xf32>, vector<32x32xf32>, vector<8x32xf32> -> vector<8x32xf32>
    %c0_14 = arith.constant 0 : index
    %c0_15 = arith.constant 0 : index
    %14 = vector.load %arg7[%c0_14, %c0_15] : memref<1x32xf32, #tpu.memory_space<vmem>>, vector<1x32xf32>
    %15 = vector.broadcast %14 : vector<1x32xf32> to vector<8x32xf32>
    %16 = arith.addf %13, %15 : vector<8x32xf32>
    %cst_16 = arith.constant 0.000000e+00 : f32
    %17 = vector.broadcast %cst_16 : f32 to vector<8x32xf32>
    %18 = arith.maximumf %16, %17 : vector<8x32xf32>
    %c0_17 = arith.constant 0 : index
    %c0_18 = arith.constant 0 : index
    %19 = vector.load %arg8[%c0_17, %c0_18] : memref<1x32xf32, #tpu.memory_space<vmem>>, vector<1x32xf32>
    %cst_19 = arith.constant dense<0.000000e+00> : vector<1x8xf32>
    %20 = tpu.matmul %19, %18, %cst_19 {dimension_numbers = #tpu.dot_dimension_numbers<[1], [1], [0], [0], [0, 0, 1, 0], [], []>} : vector<1x32xf32>, vector<8x32xf32>, vector<1x8xf32> -> vector<1x8xf32>
    %c0_20 = arith.constant 0 : index
    %c0_21 = arith.constant 0 : index
    %21 = memref.load %arg9[%c0_20, %c0_21] : memref<1x1xf32, #tpu.memory_space<smem>>
    %22 = vector.broadcast %21 : f32 to vector<1x8xf32>
    %23 = arith.addf %20, %22 : vector<1x8xf32>
    %c0_22 = arith.constant 0 : index
    %c0_23 = arith.constant 0 : index
    %24 = vector.load %arg10[%c0_22, %c0_23] : memref<1x8xf32, #tpu.memory_space<vmem>>, vector<1x8xf32>
    tpu.vector_store %arg10[%c0_22, %c0_23], %23 {strides = array<i32>} : memref<1x8xf32, #tpu.memory_space<vmem>>, vector<1x8xf32>,
    return
  }
  func.func @transform_0(%arg0: i32) -> (i32, i32) {
    %c0_i32 = arith.constant 0 : i32
    %c0_i32_0 = arith.constant 0 : i32
    return %arg0, %c0_i32 : i32, i32
  }
  func.func @transform_1(%arg0: i32) -> (i32, i32) {
    %c0_i32 = arith.constant 0 : i32
    %c0_i32_0 = arith.constant 0 : i32
    return %arg0, %c0_i32 : i32, i32
  }
  func.func @transform_2(%arg0: i32) -> (i32, i32) {
    %c0_i32 = arith.constant 0 : i32
    %c0_i32_0 = arith.constant 0 : i32
    %c0_i32_1 = arith.constant 0 : i32
    return %c0_i32, %c0_i32_0 : i32, i32
  }
  func.func @transform_3(%arg0: i32) -> (i32, i32) {
    %c0_i32 = arith.constant 0 : i32
    %c0_i32_0 = arith.constant 0 : i32
    %c0_i32_1 = arith.constant 0 : i32
    return %c0_i32, %c0_i32_0 : i32, i32
  }
  func.func @transform_4(%arg0: i32) -> (i32, i32) {
    %c0_i32 = arith.constant 0 : i32
    %c0_i32_0 = arith.constant 0 : i32
    %c0_i32_1 = arith.constant 0 : i32
    return %c0_i32, %c0_i32_0 : i32, i32
  }
  func.func @transform_5(%arg0: i32) -> (i32, i32) {
    %c0_i32 = arith.constant 0 : i32
    %c0_i32_0 = arith.constant 0 : i32
    %c0_i32_1 = arith.constant 0 : i32
    return %c0_i32, %c0_i32_0 : i32, i32
  }
  func.func @transform_6(%arg0: i32) -> (i32, i32) {
    %c0_i32 = arith.constant 0 : i32
    %c0_i32_0 = arith.constant 0 : i32
    %c0_i32_1 = arith.constant 0 : i32
    return %c0_i32, %c0_i32_0 : i32, i32
  }
  func.func @transform_7(%arg0: i32) -> (i32, i32) {
    %c0_i32 = arith.constant 0 : i32
    %c0_i32_0 = arith.constant 0 : i32
    %c0_i32_1 = arith.constant 0 : i32
    return %c0_i32, %c0_i32_0 : i32, i32
  }
  func.func @transform_8(%arg0: i32) -> (i32, i32) {
    %c0_i32 = arith.constant 0 : i32
    %c0_i32_0 = arith.constant 0 : i32
    %c0_i32_1 = arith.constant 0 : i32
    return %c0_i32, %c0_i32_0 : i32, i32
  }
  func.func @transform_9(%arg0: i32) -> (i32, i32) {
    %c0_i32 = arith.constant 0 : i32
    %c0_i32_0 = arith.constant 0 : i32
    return %c0_i32, %arg0 : i32, i32
  }
}

</mosaic_0001>

<bundles_post_ra>
// kernel: tpu_custom_call.1
= control target key start
LH: loop header
LB: loop body
LE: loop exit
PB: predicated region body
PF: predicated region fallthrough
CT: control target
= control target key end

     0   :  { %15 = vsyncpa [#allocation4], 0  ;;  %s391_s0 = inlined_call_operand.vmem [shape: f32[8,12], index: 0, kind: input, shape index: {}]   ;;  %s392_s1 = inlined_call_operand.vmem [shape: f32[8,4], index: 1, kind: input, shape index: {}]   ;;  %s393_s2 = inlined_call_operand.hbm [shape: f32[12,32], index: 2, kind: input, shape index: {}]   ;;  %s394_s3 = inlined_call_operand.vmem [shape: f32[4,32], index: 3, kind: input, shape index: {}]   ;;  %s395_s4 = inlined_call_operand.vmem [shape: f32[1,32], index: 4, kind: input, shape index: {}]   ;;  %s396_s5 = inlined_call_operand.hbm [shape: f32[32,32], index: 5, kind: input, shape index: {}]   ;;  %s397_s6 = inlined_call_operand.vmem [shape: f32[1,32], index: 6, kind: input, shape index: {}]   ;;  %s398_s7 = inlined_call_operand.vmem [shape: f32[1,32], index: 7, kind: input, shape index: {}]   ;;  %s399_s8 = inlined_call_operand.<no memory space> [shape: f32[1,1], index: 8, kind: input, shape index: {}]   ;;  %s400_s9 = inlined_call_operand.hbm [shape: f32[1,8], index: 9, kind: output, shape index: {}]  }
   0x1   :  { %16 = vsyncpa [#allocation7], 0 }
   0x2   :  { %17 = vsyncpa [#allocation5], 0  ;;  %s26_s11 = sshll.u32 %s393_s2, 4  ;;  %s306_s12 = smov [#allocation3]   ;;  %s27_s11 = int_to_ptr.hbm [resolvable:$true] %s26_s11 }
   0x3   :  { %s28_s13 = sshll.u32 %s306_s12, 4  ;;  %s43_s16 = sshll.u32 %s396_s5, 4  ;;  %s29_s13 = int_to_ptr.vmem [resolvable:$true] %s28_s13  ;;  %s44_s16 = int_to_ptr.hbm [resolvable:$true] %s43_s16 }
   0x4   :  { %s307_s17 = smov 128   ;;  %s308_s18 = smov 8  }
   0x5   :  { %34 = dma.hbm_to_vmem [thread:$0]  %s27_s11, 256, %s29_s13, [#allocation4], %s307_s17, %s307_s17, %s308_s18  }
   0x6   :  { %s309_s19 = smov [#allocation6]  }
   0x7   :  { %s45_s20 = sshll.u32 %s309_s19, 4  ;;  %s46_s20 = int_to_ptr.vmem [resolvable:$true] %s45_s20 }
   0x8   :  { %51 = dma.hbm_to_vmem [thread:$0]  %s44_s16, 512, %s46_s20, [#allocation7], %s307_s17, %s307_s17, %s308_s18  }
   0x9   :  { %300 = dma.done.wait [#allocation4], 256  }
   0xa   :  { %301 = vsyncadd [#allocation4], 4294967040 }
   0xb   :  { %302 = dma.done.wait [#allocation7], 512  }
   0xc   :  { %303 = vsyncadd [#allocation7], 4294966784  ;;  %vm75_vm0 = vcmask 1043456   ;;  %vm71_vm1 = vcmask 31744   ;;  %v68_v0 = vld [vmem:[#allocation3 + $0x8] sm:$0xf]  ;;  %v167_v20 = vstv %s399_s8 }
   0xd   :  { %v70_v1 = vld [vmem:[%s394_s3] sm:$0xf]  ;;  %216 = vmatpush.msk.msra.mxu1 %vm75_vm0, %v68_v0  ;;  %vm99_vm2 = vcmask 97280   ;;  %v135_v5 = vld [vmem:[#allocation6 + $0x18] sm:$0xff]  ;;  %v133_v7 = vld [vmem:[#allocation6 + $0x8] sm:$0xff]  ;;  %vm140_vm3 = vcmask 261120  }
   0xe   :  { %v67_v2 = vld [vmem:[#allocation3] sm:$0xff]  ;;  %214 = vmatpush.msk.msra.mxu0 %vm75_vm0, %v70_v1  ;;  %156 = vmatpush.msra.mxu2 %v135_v5  ;;  %v132_v8 = vld [vmem:[#allocation6] sm:$0xff]  ;;  %s310_s29 = smov [#allocation8]   ;;  %s203_s12 = sshll.u32 %s400_s9, 4  ;;  %vm194_vm4 = vcmask 57344   ;;  %s204_s12 = int_to_ptr.hbm [resolvable:$true] %s203_s12 }
   0xf   :  { %v69_v3 = vld [vmem:[%s392_s1] sm:$0xff]  ;;  %121 = vmatpush.msra.mxu1 %v67_v2  ;;  %s201_s30 = sshll.u32 %s310_s29, 4  ;;  %s202_s30 = int_to_ptr.vmem [resolvable:$true] %s201_s30 }
  0x10   :  { %v66_v4 = vld [vmem:[%s391_s0] sm:$0xff]  ;;  %215 = vmatmul.msk.f32.vlgmr.msra.gmra.mxu0 %vm71_vm1, %v69_v3 }
  0x11   :  { %217 = vmatmul.msk.f32.vlgmr.msra.gmra.mxu1 %vm99_vm2, %v66_v4  ;;  %v134_v6 = vld [vmem:[#allocation6 + $0x10] sm:$0xff] }
  0x12   :  { %157 = vmatpush.msra.mxu2 %v134_v6  ;;  %v226_v10 = vld [vmem:[%s395_s4] ss:$0 sm:$0xff] }
  0x13   :  { %v227_v15 = vld [vmem:[%s397_s6] ss:$0 sm:$0xff] }
  0x14   :  { %158 = vmatpush.msra.mxu2 %v133_v7  ;;  %v165_v19 = vld [vmem:[%s398_s7] sm:$0x1] }
  0x16   :  { %159 = vmatpush.msra.mxu2 %v132_v8 }
  0x8d   :  { %v96_v9 = vpop.f32.mrf.mxu0 }
  0x8e   :  { %v123_v11 = vpop.f32.mrf.mxu1 }
  0x8f   :  { %v124_v12 = vadd.f32 %v123_v11, %v96_v9 }
  0x91   :  { %v130_v13 = vadd.f32 %v226_v10, %v124_v12 }
  0x93   :  { %v131_v14 = vmax.f32 %v130_v13, 0.0 }
  0x95   :  { %218 = vmatmul.msk.f32.vlgmr.msra.gmra.mxu2 %vm140_vm3, %v131_v14 }
 0x118   :  { %v161_v16 = vpop.f32.mrf.mxu2 }
 0x119   :  { %v162_v17 = vadd.f32 %v227_v15, %v161_v16 }
 0x11b   :  { %v164_v18 = vmax.f32 %v162_v17, 0.0 }
 0x11d   :  { %219 = vmatpush.xpose.msk.msra.mxu3 %vm140_vm3, %v164_v18 }
 0x120   :  { %220 = vmatmul.msk.f32.vlgmr.msra.gmra.mxu3 %vm140_vm3, %v165_v19 }
 0x1a3   :  { %v191_v21 = vpop.f32.mrf.mxu3 }
 0x1a4   :  { %v192_v22 = vadd.f32 %v191_v21, %v167_v20 }
 0x1a6   :  { %195 = vst.msk [vmem:[#allocation8] sm:$0x1] %vm194_vm4, %v192_v22 }
 0x1a7   :  { %206 = dma.vmem_to_hbm [thread:$0]  %s202_s30, 16, %s204_s12, [#allocation5]  }
 0x1a8   :  { %304 = dma.done.wait [#allocation5], 16  }
 0x1a9   :  { %305 = vsyncadd [#allocation5], 4294967280 }
 0x1aa   :  { %211 = vsyncpa [#allocation4], 1 }
 0x1ab   :  { %212 = vsyncpa [#allocation7], 1 }
 0x1ac   :  { %213 = vsyncpa [#allocation5], 1 }

</bundles_post_ra>
